<compile_context>
chip_gen: v6e
topology: v6e:2x2x1
jax: 0.10.0
libtpu: 0.0.40
codegen_flags: <defaults>
</compile_context>

<pallas_src>
import functools

import numpy as np
import jax
import jax.numpy as jnp
from jax.experimental import pallas as pl
from jax.experimental.pallas import tpu as pltpu

_LANES = 128
_SUBLANES = 8


def _round_up(v, m):
    return (v + m - 1) // m * m


def _pad2(a, shape):
    return jnp.pad(a, [(0, t - s) for s, t in zip(a.shape, shape)])


# --------------------------------------------------------------------------
# DataAug: dropout(p=0.9) in training mode (keep w.p. 1-p, scale by 1/(1-p)).
# --------------------------------------------------------------------------
def _dropout_kernel(x_ref, r_ref, o_ref, *, threshold, scale):
    keep = r_ref[...] >= threshold          # P(keep) = 1 - p
    o_ref[...] = jnp.where(keep, x_ref[...] * scale, 0).astype(o_ref.dtype)


def data_aug(x, key, *, p=0.9):
    """Pallas equivalent of DataAug.forward (training-mode dropout)."""
    if p <= 0.0:
        return x

    orig_shape = x.shape
    n = x.size
    flat = x.reshape(-1)
    pad = (-n) % (_LANES * _SUBLANES)
    if pad:
        flat = jnp.pad(flat, (0, pad))
    rows = (n + pad) // _LANES
    x2d = flat.reshape(rows, _LANES)

    rbits = jax.random.randint(key, (rows, _LANES), 0, 1 << 24, dtype=jnp.int32)

    br = min(2048 if x.dtype.itemsize >= 4 else 4096, rows)
    nblocks = pl.cdiv(rows, br)

    threshold = int(round(p * (1 << 24)))
    scale = 1.0 / (1.0 - p)

    out2d = pl.pallas_call(
        functools.partial(_dropout_kernel, threshold=threshold, scale=scale),
        out_shape=jax.ShapeDtypeStruct((rows, _LANES), x.dtype),
        grid=(nblocks,),
        in_specs=[
            pl.BlockSpec((br, _LANES), lambda i: (i, 0)),
            pl.BlockSpec((br, _LANES), lambda i: (i, 0)),
        ],
        out_specs=pl.BlockSpec((br, _LANES), lambda i: (i, 0)),
        compiler_params=pltpu.CompilerParams(
            dimension_semantics=("parallel",),
        ),
    )(x2d, rbits)

    if pad:
        return out2d.reshape(-1)[:n].reshape(orig_shape)
    return out2d.reshape(orig_shape)


# --------------------------------------------------------------------------
# Fused Network.forward kernel.
# --------------------------------------------------------------------------
def _network_fwd_kernel(
    x_ref,
    we1, be1, we2, be2, we3, be3, we4, be4,
    wh_ref, bh_ref, wq_ref, bq_ref,
    wd1, bd1, wd2, bd2, wd3, bd3, wd4, bd4,
    h_ref, q_ref, xr_ref, z_ref,
):
    f32 = jnp.float32

    def linear(a, w_ref, b_ref, relu):
        y = jnp.dot(a, w_ref[...], preferred_element_type=f32) + b_ref[...]
        return jnp.maximum(y, 0.0) if relu else y

    x = x_ref[...].astype(f32)

    # Encoder: in -> 500 -> 500 -> 2000 -> feature_dim (hidden dims lane-padded)
    a = linear(x, we1, be1, True)
    a = linear(a, we2, be2, True)
    a = linear(a, we3, be3, True)
    z = linear(a, we4, be4, False)
    z_ref[...] = z.astype(z_ref.dtype)

    # h = L2-normalize(Linear(z), dim=1)   (torch F.normalize, eps=1e-12)
    hz = linear(z, wh_ref, bh_ref, False)
    nrm = jnp.sqrt(jnp.sum(hz * hz, axis=-1, keepdims=True))
    h_ref[...] = (hz / jnp.maximum(nrm, 1e-12)).astype(h_ref.dtype)

    # q = softmax(Linear(z), dim=1)
    qz = linear(z, wq_ref, bq_ref, False)
    qz = qz - jnp.max(qz, axis=-1, keepdims=True)
    e = jnp.exp(qz)
    q_ref[...] = (e / jnp.sum(e, axis=-1, keepdims=True)).astype(q_ref.dtype)

    # Decoder: feature_dim -> 2000 -> 500 -> 500 -> in
    d = linear(z, wd1, bd1, True)
    d = linear(d, wd2, bd2, True)
    d = linear(d, wd3, bd3, True)
    xr_ref[...] = linear(d, wd4, bd4, False).astype(xr_ref.dtype)


def network_forward(x, params, *, block_m=128):
    """Pallas fused forward of Network. Returns (h, q, xr, z)."""
    (we1, be1), (we2, be2), (we3, be3), (we4, be4) = params["encoder"]
    (wh, bh) = params["feature_head"]
    (wq, bq) = params["label_head"]
    (wd1, bd1), (wd2, bd2), (wd3, bd3), (wd4, bd4) = params["decoder"]

    m, in_dim = x.shape
    feat = we4.shape[1]
    high = wh.shape[1]
    cls = wq.shape[1]

    # Lane-pad the big hidden dims (500 -> 512, 2000 -> 2048). Zero padding is
    # exact: pad lanes stay 0 through ReLU and multiply zero weight rows.
    d_h1 = _round_up(we1.shape[1], _LANES)   # 500 -> 512
    d_h2 = _round_up(we3.shape[1], _LANES)   # 2000 -> 2048

    weight_args = [
        _pad2(we1, (in_dim, d_h1)), _pad2(be1, (1, d_h1)),
        _pad2(we2, (d_h1, d_h1)),   _pad2(be2, (1, d_h1)),
        _pad2(we3, (d_h1, d_h2)),   _pad2(be3, (1, d_h2)),
        _pad2(we4, (d_h2, feat)),   be4,
        wh, bh, wq, bq,
        _pad2(wd1, (feat, d_h2)),   _pad2(bd1, (1, d_h2)),
        _pad2(wd2, (d_h2, d_h1)),   _pad2(bd2, (1, d_h1)),
        _pad2(wd3, (d_h1, d_h1)),   _pad2(bd3, (1, d_h1)),
        _pad2(wd4, (d_h1, in_dim)), bd4,
    ]

    # Batch tiling.
    bm = min(block_m, _round_up(m, _SUBLANES))
    mp = _round_up(m, bm)
    x_p = jnp.pad(x, ((0, mp - m), (0, 0))) if mp != m else x

    in_specs = [pl.BlockSpec((bm, in_dim), lambda i: (i, 0))]
    in_specs += [pl.BlockSpec(a.shape, lambda i: (0, 0)) for a in weight_args]

    out_shape = (
        jax.ShapeDtypeStruct((mp, high), x.dtype),
        jax.ShapeDtypeStruct((mp, cls), x.dtype),
        jax.ShapeDtypeStruct((mp, in_dim), x.dtype),
        jax.ShapeDtypeStruct((mp, feat), x.dtype),
    )
    out_specs = [
        pl.BlockSpec((bm, high), lambda i: (i, 0)),
        pl.BlockSpec((bm, cls), lambda i: (i, 0)),
        pl.BlockSpec((bm, in_dim), lambda i: (i, 0)),
        pl.BlockSpec((bm, feat), lambda i: (i, 0)),
    ]

    h, q, xr, z = pl.pallas_call(
        _network_fwd_kernel,
        out_shape=out_shape,
        grid=(mp // bm,),
        in_specs=in_specs,
        out_specs=out_specs,
        compiler_params=pltpu.CompilerParams(
            dimension_semantics=("parallel",),
            vmem_limit_bytes=40 * 1024 * 1024,
        ),
    )(x_p, *weight_args)

    return h[:m], q[:m], xr[:m], z[:m]


# --------------------------------------------------------------------------
# Parameter init (torch nn.Linear style) and pure-JAX reference.
# --------------------------------------------------------------------------
def init_network_params(key, input_size, feature_dim, high_feature_dim, class_num):
    dims_enc = [(input_size, 500), (500, 500), (500, 2000), (2000, feature_dim)]
    dims_dec = [(feature_dim, 2000), (2000, 500), (500, 500), (500, input_size)]
    keys = jax.random.split(key, 10)

    def lin(k, fan_in, fan_out):
        kw, kb = jax.random.split(k)
        bound = 1.0 / float(np.sqrt(fan_in))
        w = jax.random.uniform(kw, (fan_in, fan_out), jnp.float32, -bound, bound)
        b = jax.random.uniform(kb, (1, fan_out), jnp.float32, -bound, bound)
        return w, b

    enc = [lin(keys[i], *dims_enc[i]) for i in range(4)]
    dec = [lin(keys[4 + i], *dims_dec[i]) for i in range(4)]
    return {
        "encoder": enc,
        "decoder": dec,
        "feature_head": lin(keys[8], feature_dim, high_feature_dim),
        "label_head": lin(keys[9], feature_dim, class_num),
    }


def network_forward_ref(x, params):
    hp = jax.lax.Precision.HIGHEST

    def lin(a, wb):
        return jnp.dot(a, wb[0], precision=hp) + wb[1]

    a = x
    for wb in params["encoder"][:-1]:
        a = jax.nn.relu(lin(a, wb))
    z = lin(a, params["encoder"][-1])
    hz = lin(z, params["feature_head"])
    h = hz / jnp.maximum(jnp.linalg.norm(hz, axis=1, keepdims=True), 1e-12)
    q = jax.nn.softmax(lin(z, params["label_head"]), axis=1)
    d = z
    for wb in params["decoder"][:-1]:
        d = jax.nn.relu(lin(d, wb))
    xr = lin(d, params["decoder"][-1])
    return h, q, xr, z


if __name__ == "__main__":
    key = jax.random.PRNGKey(0)
    k_x, k_drop, k_par = jax.random.split(key, 3)

    batch, input_size = 8, 32
    feature_dim, high_feature_dim, class_num = 64, 32, 8

    x = jax.random.normal(k_x, (batch, input_size), dtype=jnp.float32)
    params = init_network_params(k_par, input_size, feature_dim,
                                 high_feature_dim, class_num)

    # DataAug (training-time dropout, p=0.9) followed by Network.forward,
    # as done in Network.pretrain / Network.train.
    x_aug = data_aug(x, k_drop, p=0.9)
    h, q, xr, z = network_forward(x_aug, params)
    h, q, xr, z, x_aug = jax.block_until_ready((h, q, xr, z, x_aug))

    # Shapes.
    assert h.shape == (batch, high_feature_dim)
    assert q.shape == (batch, class_num)
    assert xr.shape == (batch, input_size)
    assert z.shape == (batch, feature_dim)

    # Dropout sanity (p=0.9 -> ~10% kept).
    keep_frac = float(jnp.mean((x_aug != 0).astype(jnp.float32)))
    assert 0.02 <= keep_frac <= 0.25

    # Row-wise semantics: softmax rows sum to 1, h rows are unit-norm.
    assert bool(jnp.allclose(jnp.sum(q, axis=1), 1.0, atol=1e-5))
    assert bool(jnp.allclose(jnp.linalg.norm(h, axis=1), 1.0, atol=1e-4))

    # Match pure-JAX reference of the same forward on the same augmented input.
    h_r, q_r, xr_r, z_r = network_forward_ref(x_aug, params)
    for got, ref in ((h, h_r), (q, q_r), (xr, xr_r), (z, z_r)):
        assert bool(jnp.allclose(got, ref, rtol=5e-3, atol=5e-3))

    print("KERNEL_OK")
</pallas_src>

<mosaic_0001>
module attributes {stable_mosaic.version = 11 : i64} {
  func.func @_dropout_kernel(%arg0: i32, %arg1: memref<8x128xf32, #tpu.memory_space<vmem>>, %arg2: memref<8x128xi32, #tpu.memory_space<vmem>>, %arg3: memref<8x128xf32, #tpu.memory_space<vmem>>) attributes {dimension_semantics = [#tpu.dimension_semantics<parallel>], iteration_bounds = array<i64: 1>, scalar_prefetch = 0 : i64, scratch_operands = 0 : i64, tpu.core_type = #tpu.core_type<tc>, window_params = [{transform_indices = @transform_0, window_bounds = array<i64: 8, 128>}, {transform_indices = @transform_1, window_bounds = array<i64: 8, 128>}, {transform_indices = @transform_2, window_bounds = array<i64: 8, 128>}]} {
    %c0 = arith.constant 0 : index
    %c0_0 = arith.constant 0 : index
    %0 = vector.load %arg2[%c0, %c0_0] : memref<8x128xi32, #tpu.memory_space<vmem>>, vector<8x128xi32>
    %c15099494_i32 = arith.constant 15099494 : i32
    %1 = vector.broadcast %c15099494_i32 : i32 to vector<8x128xi32>
    %2 = arith.cmpi sge, %0, %1 : vector<8x128xi32>
    %c0_1 = arith.constant 0 : index
    %c0_2 = arith.constant 0 : index
    %3 = vector.load %arg1[%c0_1, %c0_2] : memref<8x128xf32, #tpu.memory_space<vmem>>, vector<8x128xf32>
    %cst = arith.constant 1.000000e+01 : f32
    %4 = vector.broadcast %cst : f32 to vector<8x128xf32>
    %5 = arith.mulf %3, %4 : vector<8x128xf32>
    %c0_i32 = arith.constant 0 : i32
    %6 = arith.sitofp %c0_i32 : i32 to f32
    %7 = vector.broadcast %6 : f32 to vector<8x128xf32>
    %8 = arith.select %2, %5, %7 : vector<8x128xi1>, vector<8x128xf32>
    %c0_3 = arith.constant 0 : index
    %c0_4 = arith.constant 0 : index
    %9 = vector.load %arg3[%c0_3, %c0_4] : memref<8x128xf32, #tpu.memory_space<vmem>>, vector<8x128xf32>
    tpu.vector_store %arg3[%c0_3, %c0_4], %8 {strides = array<i32>} : memref<8x128xf32, #tpu.memory_space<vmem>>, vector<8x128xf32>,
    return
  }
  func.func @transform_0(%arg0: i32) -> (i32, i32) {
    %c0_i32 = arith.constant 0 : i32
    %c0_i32_0 = arith.constant 0 : i32
    return %arg0, %c0_i32 : i32, i32
  }
  func.func @transform_1(%arg0: i32) -> (i32, i32) {
    %c0_i32 = arith.constant 0 : i32
    %c0_i32_0 = arith.constant 0 : i32
    return %arg0, %c0_i32 : i32, i32
  }
  func.func @transform_2(%arg0: i32) -> (i32, i32) {
    %c0_i32 = arith.constant 0 : i32
    %c0_i32_0 = arith.constant 0 : i32
    return %arg0, %c0_i32 : i32, i32
  }
}

</mosaic_0001>

<bundles_post_ra>
// kernel: tpu_custom_call.1
= control target key start
LH: loop header
LB: loop body
LE: loop exit
PB: predicated region body
PF: predicated region fallthrough
CT: control target
= control target key end

     0   :  { %7 = vsyncpa [#allocation3], 0  ;;  %s154_s0 = inlined_call_operand.hbm [shape: f32[8,128], index: 0, kind: input, shape index: {}]   ;;  %s155_s1 = inlined_call_operand.hbm [shape: s32[8,128], index: 1, kind: input, shape index: {}]   ;;  %s156_s2 = inlined_call_operand.hbm [shape: f32[8,128], index: 2, kind: output, shape index: {}]  }
   0x1   :  { %8 = vsyncpa [#allocation6], 0 }
   0x2   :  { %9 = vsyncpa [#allocation4], 0  ;;  %s127_s9 = smov [#allocation2]   ;;  %s128_s11 = smov [#allocation5]  }
   0x3   :  { %s16_s10 = sshll.u32 %s127_s9, 4  ;;  %s26_s12 = sshll.u32 %s128_s11, 4  ;;  %s17_s10 = int_to_ptr.vmem [resolvable:$true] %s16_s10  ;;  %s27_s12 = int_to_ptr.vmem [resolvable:$true] %s26_s12 }
   0x4   :  { %s69_s13 = scalar_lea.vmem %s17_s10, 128  ;;  %p74_p1 = scmp.lt.s32.totalorder %s17_s10, %s17_s10 }
   0x5   :  { %p70_p0 = scmp.ne.s32.totalorder %s17_s10, %s69_s13  ;;  %p75_p2 = scmp.lt.s32.totalorder %s69_s13, %s69_s13 }
   0x7   :  { %p76_p3 = por %p75_p2, %p74_p1 }
   0x9   :  { %p77_p4 = pnand %p76_p3, %p70_p0 }
   0xb   :  { %80 = shalt.err (!%p77_p4)
}
   0xc   :  { %19 = dma.hbm_to_vmem [thread:$0]  %s154_s0, 128, %s17_s10, [#allocation3]  }
   0xd   :  { %s89_s16 = scalar_lea.vmem %s27_s12, 128  ;;  %p94_p6 = scmp.lt.s32.totalorder %s27_s12, %s27_s12 }
   0xe   :  { %p90_p5 = scmp.ne.s32.totalorder %s27_s12, %s89_s16  ;;  %p95_p7 = scmp.lt.s32.totalorder %s89_s16, %s89_s16 }
  0x10   :  { %p96_p8 = por %p95_p7, %p94_p6 }
  0x12   :  { %p97_p9 = pnand %p96_p8, %p90_p5 }
  0x14   :  { %100 = shalt.err (!%p97_p9)
}
  0x15   :  { %29 = dma.hbm_to_vmem [thread:$0]  %s155_s1, 128, %s27_s12, [#allocation6]  }
  0x16   :  { %121 = dma.done.wait [#allocation3], 128  }
  0x17   :  { %122 = vsyncadd [#allocation3], 4294967168 }
  0x18   :  { %123 = dma.done.wait [#allocation6], 128  }
  0x19   :  { %124 = vsyncadd [#allocation6], 4294967168  ;;  %s129_s19 = smov [#allocation7]   ;;  %v36_v0 = vld [vmem:[#allocation5] sm:$0xff]  ;;  %v38_v1 = vld [vmem:[#allocation2] sm:$0xff] }
  0x1a   :  { %s48_s20 = sshll.u32 %s129_s19, 4  ;;  %vm37_vm0 = vcmp.ge.s32.totalorder %v36_v0, 15099494  ;;  %v39_v2 = vmul.f32 10.0, %v38_v1  ;;  %s49_s20 = int_to_ptr.vmem [resolvable:$true] %s48_s20 }
  0x1b   :  { %s101_s0 = scalar_lea.vmem %s49_s20, 128  ;;  %p106_p11 = scmp.lt.s32.totalorder %s49_s20, %s49_s20 }
  0x1c   :  { %v40_v3 = vsel %vm37_vm0, %v39_v2, 0.0  ;;  %p102_p10 = scmp.ne.s32.totalorder %s49_s20, %s101_s0  ;;  %p107_p12 = scmp.lt.s32.totalorder %s101_s0, %s101_s0 }
  0x1d   :  { %41 = vst [vmem:[#allocation7] sm:$0xff] %v40_v3 }
  0x1e   :  { %p108_p13 = por %p107_p12, %p106_p11 }
  0x20   :  { %p109_p0 = pnand %p108_p13, %p102_p10 }
  0x22   :  { %112 = shalt.err (!%p109_p0)
}
  0x23   :  { %51 = dma.vmem_to_hbm [thread:$0]  %s49_s20, 128, %s156_s2, [#allocation4]  }
  0x24   :  { %125 = dma.done.wait [#allocation4], 128  }
  0x25   :  { %126 = vsyncadd [#allocation4], 4294967168 }
  0x26   :  { %55 = vsyncpa [#allocation3], 1 }
  0x27   :  { %56 = vsyncpa [#allocation6], 1 }
  0x28   :  { %57 = vsyncpa [#allocation4], 1 }

</bundles_post_ra>
